<compile_context>
chip_gen: v5e
topology: v5e:2x2
jax: 0.10.0
libtpu: 0.0.40
codegen_flags: <defaults>
</compile_context>

<pallas_src>
import jax
import jax.numpy as jnp
from jax.experimental import pallas as pl
from jax.experimental.pallas import tpu as pltpu


# ----------------------------------------------------------------------------
# Specialized kernel for the module's shape (N*H*W == 1): pure matvec on the VPU.
#   x_ref: (1, K)      bf16  activations, K on the lane axis (lane-dense)
#   w_ref: (C_out, K)  bf16  un-transposed PyTorch weight (lane-dense)
#   b_ref: (C_out, 1)  f32
#   o_ref: (C_out, 1)  f32
# ----------------------------------------------------------------------------
def _conv1x1_matvec_kernel(x_ref, w_ref, b_ref, o_ref):
    x = x_ref[...].astype(jnp.float32)              # (1, K)
    w = w_ref[...].astype(jnp.float32)              # (C_out, K)
    prod = w * x                                    # VPU, broadcast over sublanes
    acc = jnp.sum(prod, axis=1, keepdims=True)      # XLU lane reduce -> (C_out, 1)
    o_ref[...] = (acc + b_ref[...]).astype(o_ref.dtype)


# ----------------------------------------------------------------------------
# General fallback (N*H*W > 1): standard (M,K) x (K,C_out) MXU matmul.
# Weight is pre-transposed once in the wrapper (off the module's actual path) so
# the in-kernel dot is a plain non-transposed matmul -- no ambiguity in lowering.
# ----------------------------------------------------------------------------
def _conv1x1_matmul_kernel(x_ref, w_ref, b_ref, o_ref):
    acc = jnp.dot(x_ref[...], w_ref[...], preferred_element_type=jnp.float32)
    o_ref[...] = (acc + b_ref[...]).astype(o_ref.dtype)


def conv2d_1x1(x_nchw, weight, bias):
    """1x1 conv, stride 1.

    x_nchw : (N, C_in, H, W)
    weight : (C_out, C_in, 1, 1)
    bias   : (C_out,)
    returns: (N, C_out, H, W)
    """
    N, C_in, H, W = x_nchw.shape
    C_out = weight.shape[0]
    M = N * H * W
    out_dtype = x_nchw.dtype

    w_mat = weight.reshape(C_out, C_in)

    if M == 1:
        # --- the module's actual path: transpose-free end to end -------------
        x_row = x_nchw.reshape(1, C_in).astype(jnp.bfloat16)         # pure reshape
        w_bf = w_mat.astype(jnp.bfloat16)                            # (C_out, C_in) lane-dense
        b_col = bias.reshape(C_out, 1).astype(jnp.float32)

        bytes_accessed = (x_row.size + w_bf.size) * 2 + (b_col.size + C_out) * 4
        out_col = pl.pallas_call(
            _conv1x1_matvec_kernel,
            out_shape=jax.ShapeDtypeStruct((C_out, 1), out_dtype),
            in_specs=[
                pl.BlockSpec(memory_space=pltpu.MemorySpace.VMEM),
                pl.BlockSpec(memory_space=pltpu.MemorySpace.VMEM),
                pl.BlockSpec(memory_space=pltpu.MemorySpace.VMEM),
            ],
            out_specs=pl.BlockSpec(memory_space=pltpu.MemorySpace.VMEM),
            cost_estimate=pl.CostEstimate(
                flops=2 * C_in * C_out,
                transcendentals=0,
                bytes_accessed=int(bytes_accessed),
            ),
        )(x_row, w_bf, b_col)
        # (C_out, 1) -> (1, C_out, 1, 1): pure reshape, no transpose.
        return out_col.reshape(N, C_out, H, W)

    # --- general fallback ----------------------------------------------------
    x_mat = jnp.transpose(x_nchw, (0, 2, 3, 1)).reshape(M, C_in).astype(jnp.bfloat16)
    w_kn = w_mat.T.astype(jnp.bfloat16)                # (C_in, C_out), one-time transpose
    b_row = bias.reshape(1, C_out).astype(jnp.float32)

    bytes_accessed = (x_mat.size + w_kn.size) * 2 + (b_row.size + M * C_out) * 4
    out_mat = pl.pallas_call(
        _conv1x1_matmul_kernel,
        out_shape=jax.ShapeDtypeStruct((M, C_out), out_dtype),
        in_specs=[
            pl.BlockSpec(memory_space=pltpu.MemorySpace.VMEM),
            pl.BlockSpec(memory_space=pltpu.MemorySpace.VMEM),
            pl.BlockSpec(memory_space=pltpu.MemorySpace.VMEM),
        ],
        out_specs=pl.BlockSpec(memory_space=pltpu.MemorySpace.VMEM),
        cost_estimate=pl.CostEstimate(
            flops=2 * M * C_in * C_out,
            transcendentals=0,
            bytes_accessed=int(bytes_accessed),
        ),
    )(x_mat, w_kn, b_row)
    return jnp.transpose(out_mat.reshape(N, H, W, C_out), (0, 3, 1, 2))


if __name__ == "__main__":
    key = jax.random.PRNGKey(0)
    kx, kw, kb, kx2 = jax.random.split(key, 4)

    # Shapes implied by the module's forward: x346 = randn([1, 960, 1, 1])
    N, C_in, H, W = 1, 960, 1, 1
    C_out = 40

    x = jax.random.normal(kx, (N, C_in, H, W), dtype=jnp.float32)
    # Deterministic parameter init (synthetic; matches Conv2d param shapes).
    fan_in = C_in * 1 * 1
    bound = 1.0 / (fan_in ** 0.5)
    weight = jax.random.uniform(kw, (C_out, C_in, 1, 1), dtype=jnp.float32,
                                minval=-bound, maxval=bound)
    bias = jax.random.uniform(kb, (C_out,), dtype=jnp.float32,
                              minval=-bound, maxval=bound)

    out = conv2d_1x1(x, weight, bias)
    out = jax.block_until_ready(out)
    assert out.shape == (N, C_out, H, W), out.shape

    # Reference 1: full f32 math (loose tolerance to cover the bf16 operand cast).
    ref_f32 = (jnp.einsum('nchw,oc->nohw', x, weight.reshape(C_out, C_in))
               + bias.reshape(1, C_out, 1, 1))
    assert jnp.allclose(out, ref_f32, atol=5e-2, rtol=5e-2), "mismatch vs f32 reference"

    # Reference 2: bf16 operands, f32 accumulation (what the kernel computes).
    xb = x.reshape(1, C_in).astype(jnp.bfloat16).astype(jnp.float32)
    wb = weight.reshape(C_out, C_in).astype(jnp.bfloat16).astype(jnp.float32)
    ref_bf = (xb @ wb.T + bias.reshape(1, C_out)).reshape(N, C_out, H, W)
    assert jnp.allclose(out, ref_bf, atol=1e-3, rtol=1e-3), "mismatch vs bf16 reference"

    # Sanity-check the general fallback path on a tiny shape.
    N2, C2_in, H2, W2, C2_out = 2, 32, 4, 4, 16
    x2 = jax.random.normal(kx2, (N2, C2_in, H2, W2), dtype=jnp.float32)
    w2 = jax.random.uniform(kw, (C2_out, C2_in, 1, 1), dtype=jnp.float32,
                            minval=-0.2, maxval=0.2)
    b2 = jax.random.uniform(kb, (C2_out,), dtype=jnp.float32, minval=-0.2, maxval=0.2)
    out2 = jax.block_until_ready(conv2d_1x1(x2, w2, b2))
    ref2 = (jnp.einsum('nchw,oc->nohw', x2, w2.reshape(C2_out, C2_in))
            + b2.reshape(1, C2_out, 1, 1))
    assert out2.shape == (N2, C2_out, H2, W2), out2.shape
    assert jnp.allclose(out2, ref2, atol=5e-2, rtol=5e-2), "mismatch vs reference (general)"

    print("KERNEL_OK")
</pallas_src>

<mosaic_0001>
module attributes {stable_mosaic.version = 11 : i64} {
  func.func @_conv1x1_matvec_kernel(%arg0: memref<1x960xbf16, #tpu.memory_space<vmem>>, %arg1: memref<40x960xbf16, #tpu.memory_space<vmem>>, %arg2: memref<40x1xf32, #tpu.memory_space<vmem>>, %arg3: memref<40x1xf32, #tpu.memory_space<vmem>>) attributes {dimension_semantics = [], scalar_prefetch = 0 : i64, scratch_operands = 0 : i64, tpu.core_type = #tpu.core_type<tc>} {
    %c0 = arith.constant 0 : index
    %c0_0 = arith.constant 0 : index
    %0 = vector.load %arg0[%c0, %c0_0] : memref<1x960xbf16, #tpu.memory_space<vmem>>, vector<1x960xbf16>
    %1 = arith.extf %0 : vector<1x960xbf16> to vector<1x960xf32>
    %c0_1 = arith.constant 0 : index
    %c0_2 = arith.constant 0 : index
    %2 = vector.load %arg1[%c0_1, %c0_2] : memref<40x960xbf16, #tpu.memory_space<vmem>>, vector<40x960xbf16>
    %3 = arith.extf %2 : vector<40x960xbf16> to vector<40x960xf32>
    %4 = vector.broadcast %1 : vector<1x960xf32> to vector<40x960xf32>
    %5 = arith.mulf %3, %4 : vector<40x960xf32>
    %cst = arith.constant dense<0.000000e+00> : vector<40xf32>
    %6 = vector.multi_reduction <add>, %5, %cst [1] : vector<40x960xf32> to vector<40xf32>
    %7 = vector.shape_cast %6 : vector<40xf32> to vector<40x1xf32>
    %c0_3 = arith.constant 0 : index
    %c0_4 = arith.constant 0 : index
    %8 = vector.load %arg2[%c0_3, %c0_4] : memref<40x1xf32, #tpu.memory_space<vmem>>, vector<40x1xf32>
    %9 = arith.addf %7, %8 : vector<40x1xf32>
    %c0_5 = arith.constant 0 : index
    %c0_6 = arith.constant 0 : index
    %10 = vector.load %arg3[%c0_5, %c0_6] : memref<40x1xf32, #tpu.memory_space<vmem>>, vector<40x1xf32>
    tpu.vector_store %arg3[%c0_5, %c0_6], %9 {strides = array<i32>} : memref<40x1xf32, #tpu.memory_space<vmem>>, vector<40x1xf32>,
    return
  }
}

</mosaic_0001>

<bundles_post_ra>
// kernel: tpu_custom_call.1
= control target key start
LH: loop header
LB: loop body
LE: loop exit
PB: predicated region body
PF: predicated region fallthrough
CT: control target
= control target key end

     0   :  { %8 = vsyncpa [#allocation3], 0  ;;  %s260_s15 = smov [#allocation2]   ;;  %s261_s17 = smov 512   ;;  %s385_s0 = inlined_call_operand.vmem [shape: bf16[1,960], index: 0, kind: input, shape index: {}]   ;;  %s386_s1 = inlined_call_operand.hbm [shape: bf16[40,960], index: 1, kind: input, shape index: {}]   ;;  %s387_s2 = inlined_call_operand.vmem [shape: f32[40,1], index: 2, kind: input, shape index: {}]   ;;  %s388_s3 = inlined_call_operand.vmem [shape: f32[40,1], index: 3, kind: output, shape index: {}]  }
   0x1   :  { %s15_s14 = sshll.u32 %s386_s1, 4  ;;  %s17_s16 = sshll.u32 %s260_s15, 4  ;;  %s16_s14 = int_to_ptr.hbm [resolvable:$true] %s15_s14  ;;  %s18_s16 = int_to_ptr.vmem [resolvable:$true] %s17_s16 }
   0x2   :  { %s262_s18 = smov 32  }
   0x3   :  { %23 = dma.hbm_to_vmem [thread:$0]  %s16_s14, 2560, %s18_s16, [#allocation3], %s261_s17, %s261_s17, %s262_s18  }
   0x4   :  { %258 = dma.done.wait [#allocation3], 2560  }
   0x5   :  { %259 = vsyncadd [#allocation3], 4294964736  ;;  %v30_v0 = vld [vmem:[%s385_s0] sm:$0xff]  ;;  %v42_v2 = vld [vmem:[#allocation2 + $0x48] sm:$0xff]  ;;  %vm165_vm0 = vcmask 523264   ;;  %vm220_vm1 = vcmask 7168  }
   0x6   :  { %v41_v1 = vld [vmem:[#allocation2 + $0x40] sm:$0xff]  ;;  %v31_v3 = vunpack.c.l.bf16 %v30_v0  ;;  %v32_v4 = vunpack.c.h.bf16 %v30_v0  ;;  %v43_v5 = vld [vmem:[#allocation2 + $0x50] sm:$0xff]  ;;  %v44_v8 = vld [vmem:[#allocation2 + $0x58] sm:$0xff]  ;;  %v71_v9 = vunpack.c.l.bf16 %v42_v2  ;;  %v72_v10 = vunpack.c.h.bf16 %v42_v2 }
   0x7   :  { %v69_v6 = vunpack.c.l.bf16 %v41_v1  ;;  %v70_v7 = vunpack.c.h.bf16 %v41_v1  ;;  %v73_v13 = vunpack.c.l.bf16 %v43_v5  ;;  %v76_v21 = vunpack.c.h.bf16 %v44_v8  ;;  %v33_v25 = vld [vmem:[#allocation2] sm:$0xff]  ;;  %v34_v30 = vld [vmem:[#allocation2 + $0x8] sm:$0xff]  ;;  %v35_v37 = vld [vmem:[#allocation2 + $0x10] sm:$0xff] }
   0x8   :  { %v95_v11 = vperm.slane %v31_v3, 0  ;;  %v96_v12 = vperm.slane %v31_v3, 2  ;;  %v97_v14 = vperm.slane %v31_v3, 4  ;;  %v98_v15 = vperm.slane %v31_v3, 6  ;;  %v36_v40 = vld [vmem:[#allocation2 + $0x18] sm:$0xff]  ;;  %v49_v47 = vld [vmem:[#allocation2 + $0x80] sm:$0xff] }
   0x9   :  { %v99_v16 = vperm.slane %v32_v4, 0  ;;  %v100_v17 = vperm.slane %v32_v4, 2  ;;  %v102_v18 = vperm.slane %v32_v4, 6  ;;  %v101_v22 = vperm.slane %v32_v4, 4  ;;  %v50_v52 = vld [vmem:[#allocation2 + $0x88] sm:$0xff]  ;;  %v51_v63 = vld [vmem:[#allocation2 + $0x90] sm:$0xff] }
   0xa   :  { %v289_v19 = vperm.slane %v95_v11, 0  ;;  %v291_v20 = vperm.slane %v96_v12, 0  ;;  %v293_v23 = vperm.slane %v97_v14, 0  ;;  %v295_v24 = vperm.slane %v98_v15, 0  ;;  %v45_v11 = vld [vmem:[#allocation2 + $0x60] sm:$0xff] }
   0xb   :  { %v297_v26 = vperm.slane %v99_v16, 0  ;;  %v299_v27 = vperm.slane %v102_v18, 0  ;;  %v74_v31 = vunpack.c.h.bf16 %v43_v5  ;;  %v75_v32 = vunpack.c.l.bf16 %v44_v8  ;;  %v52_v5 = vld [vmem:[#allocation2 + $0x98] sm:$0xff]  ;;  %v46_v16 = vld [vmem:[#allocation2 + $0x68] sm:$0xff] }
   0xc   :  { %v135_v28 = vmul.f32 %v289_v19, %v69_v6  ;;  %v136_v29 = vmul.f32 %v291_v20, %v70_v7  ;;  %v137_v33 = vmul.f32 %v293_v23, %v71_v9  ;;  %v304_v34 = vperm.slane %v100_v17, 0 }
   0xd   :  { %v138_v35 = vmul.f32 %v295_v24, %v72_v10  ;;  %v53_v38 = vunpack.c.l.bf16 %v33_v25  ;;  %v307_v39 = vperm.slane %v101_v22, 0  ;;  %v54_v41 = vunpack.c.h.bf16 %v33_v25 }
   0xe   :  { %v180_v36 = vadd.f32 %v136_v29, %v135_v28  ;;  %v55_v42 = vunpack.c.l.bf16 %v34_v30  ;;  %v56_v43 = vunpack.c.h.bf16 %v34_v30  ;;  %v139_v44 = vmul.f32 %v297_v26, %v73_v13  ;;  %v47_v30 = vld [vmem:[#allocation2 + $0x70] sm:$0xff] }
   0xf   :  { %v142_v45 = vmul.f32 %v299_v27, %v76_v21  ;;  %v57_v48 = vunpack.c.l.bf16 %v35_v37  ;;  %v119_v49 = vmul.f32 %v289_v19, %v53_v38  ;;  %v120_v50 = vmul.f32 %v291_v20, %v54_v41  ;;  %v48_v41 = vld [vmem:[#allocation2 + $0x78] sm:$0xff] }
  0x10   :  { %v181_v46 = vadd.f32 %v180_v36, %v137_v33  ;;  %v121_v51 = vmul.f32 %v293_v23, %v55_v42  ;;  %v140_v53 = vmul.f32 %v304_v34, %v74_v31  ;;  %v58_v55 = vunpack.c.h.bf16 %v35_v37 }
  0x11   :  { %v59_v56 = vunpack.c.l.bf16 %v36_v40  ;;  %v141_v57 = vmul.f32 %v307_v39, %v75_v32  ;;  %v122_v58 = vmul.f32 %v295_v24, %v56_v43  ;;  %v159_v59 = vadd.f32 %v120_v50, %v119_v49 }
  0x12   :  { %v182_v54 = vadd.f32 %v181_v46, %v138_v35  ;;  %v85_v60 = vunpack.c.l.bf16 %v49_v47  ;;  %v60_v62 = vunpack.c.h.bf16 %v36_v40  ;;  %v86_v0 = vunpack.c.h.bf16 %v49_v47 }
  0x13   :  { %v87_v1 = vunpack.c.l.bf16 %v50_v52  ;;  %v186_v2 = vsel %vm165_vm0, %v142_v45, 0.0  ;;  %v123_v3 = vmul.f32 %v297_v26, %v57_v48  ;;  %v160_v4 = vadd.f32 %v159_v59, %v121_v51  ;;  %v37_v51 = vld [vmem:[#allocation2 + $0x20] sm:$0xff] }
  0x14   :  { %v183_v61 = vadd.f32 %v182_v54, %v139_v44  ;;  %v88_v6 = vunpack.c.h.bf16 %v50_v52  ;;  %v124_v8 = vmul.f32 %v304_v34, %v58_v55  ;;  %v125_v9 = vmul.f32 %v307_v39, %v59_v56  ;;  %v38_v52 = vld [vmem:[#allocation2 + $0x28] sm:$0xff] }
  0x15   :  { %v151_v10 = vmul.f32 %v289_v19, %v85_v60  ;;  %v161_v12 = vadd.f32 %v160_v4, %v122_v58  ;;  %v89_v13 = vunpack.c.l.bf16 %v51_v63  ;;  %v152_v14 = vmul.f32 %v291_v20, %v86_v0 }
  0x16   :  { %v184_v7 = vadd.f32 %v183_v61, %v140_v53  ;;  %v153_v15 = vmul.f32 %v293_v23, %v87_v1  ;;  %v126_v18 = vmul.f32 %v299_v27, %v60_v62  ;;  %v90_v21 = vunpack.c.h.bf16 %v51_v63  ;;  %v39_v61 = vld [vmem:[#allocation2 + $0x30] sm:$0xff] }
  0x17   :  { %v91_v22 = vunpack.c.l.bf16 %v52_v5  ;;  %v162_v25 = vadd.f32 %v161_v12, %v123_v3  ;;  %v154_v28 = vmul.f32 %v295_v24, %v88_v6  ;;  %v200_v29 = vadd.f32 %v152_v14, %v151_v10  ;;  %v40_v12 = vld [vmem:[#allocation2 + $0x38] sm:$0xff] }
  0x18   :  { %v185_v17 = vadd.f32 %v184_v7, %v141_v57  ;;  %v77_v31 = vunpack.c.l.bf16 %v45_v11  ;;  %v92_v33 = vunpack.c.h.bf16 %v52_v5  ;;  %v78_v35 = vunpack.c.h.bf16 %v45_v11 }
  0x19   :  { %v79_v36 = vunpack.c.l.bf16 %v46_v16  ;;  %v163_v37 = vadd.f32 %v162_v25, %v124_v8  ;;  %v155_v38 = vmul.f32 %v297_v26, %v89_v13  ;;  %v201_v40 = vadd.f32 %v200_v29, %v153_v15 }
  0x1a   :  { %v187_v32 = vadd.f32 %v186_v2, %v185_v17  ;;  %v80_v42 = vunpack.c.h.bf16 %v46_v16  ;;  %v166_v43 = vsel %vm165_vm0, %v126_v18, 0.0  ;;  %v156_v44 = vmul.f32 %v304_v34, %v90_v21 }
  0x1b   :  { %v81_v45 = vunpack.c.l.bf16 %v47_v30  ;;  %v143_v46 = vmul.f32 %v289_v19, %v77_v31  ;;  %v164_v47 = vadd.f32 %v163_v37, %v125_v9  ;;  %v202_v48 = vadd.f32 %v201_v40, %v154_v28 }
  0x1c   :  { %188 = vadd.xlane.f32.xlu1 %v187_v32  ;;  %v144_v49 = vmul.f32 %v291_v20, %v78_v35  ;;  %v145_v50 = vmul.f32 %v293_v23, %v79_v36  ;;  %v157_v53 = vmul.f32 %v307_v39, %v91_v22  ;;  %v158_v54 = vmul.f32 %v299_v27, %v92_v33 }
  0x1d   :  { %v82_v55 = vunpack.c.h.bf16 %v47_v30  ;;  %v83_v56 = vunpack.c.l.bf16 %v48_v41  ;;  %v167_v57 = vadd.f32 %v166_v43, %v164_v47  ;;  %v203_v58 = vadd.f32 %v202_v48, %v155_v38  ;;  %v213_v48 = vld [vmem:[%s387_s2 + $0x18] sm:$0xff] }
  0x1e   :  { %v146_v59 = vmul.f32 %v295_v24, %v80_v42  ;;  %v190_v60 = vadd.f32 %v144_v49, %v143_v46  ;;  %v84_v62 = vunpack.c.h.bf16 %v48_v41  ;;  %v61_v63 = vunpack.c.l.bf16 %v37_v51 }
  0x1f   :  { %v62_v0 = vunpack.c.h.bf16 %v37_v51  ;;  %v63_v1 = vunpack.c.l.bf16 %v38_v52  ;;  %168 = vadd.xlane.f32.xlu0 %v167_v57  ;;  %v204_v2 = vadd.f32 %v203_v58, %v156_v44  ;;  %v147_v3 = vmul.f32 %v297_v26, %v81_v45  ;;  %v214_v45 = vld [vmem:[%s387_s2 + $0x20] sm:$0xff]  ;;  %v211_v51 = vld [vmem:[%s387_s2 + $0x8] sm:$0xff] }
  0x20   :  { %v191_v4 = vadd.f32 %v190_v60, %v145_v50  ;;  %v64_v5 = vunpack.c.h.bf16 %v38_v52  ;;  %v206_v6 = vsel %vm165_vm0, %v158_v54, 0.0  ;;  %v148_v7 = vmul.f32 %v304_v34, %v82_v55 }
  0x21   :  { %v65_v8 = vunpack.c.l.bf16 %v39_v61  ;;  %v127_v9 = vmul.f32 %v289_v19, %v61_v63  ;;  %v205_v10 = vadd.f32 %v204_v2, %v157_v53  ;;  %v128_v13 = vmul.f32 %v291_v20, %v62_v0 }
  0x22   :  { %v192_v11 = vadd.f32 %v191_v4, %v146_v59  ;;  %v129_v14 = vmul.f32 %v293_v23, %v63_v1  ;;  %v149_v15 = vmul.f32 %v307_v39, %v83_v56  ;;  %v150_v16 = vmul.f32 %v299_v27, %v84_v62 }
  0x23   :  { %v66_v17 = vunpack.c.h.bf16 %v39_v61  ;;  %v207_v18 = vadd.f32 %v206_v6, %v205_v10  ;;  %v130_v22 = vmul.f32 %v295_v24, %v64_v5  ;;  %v170_v25 = vadd.f32 %v128_v13, %v127_v9 }
  0x24   :  { %v193_v21 = vadd.f32 %v192_v11, %v147_v3  ;;  %v68_v28 = vunpack.c.h.bf16 %v40_v12  ;;  %v67_v29 = vunpack.c.l.bf16 %v40_v12  ;;  %v131_v30 = vmul.f32 %v297_v26, %v65_v8  ;;  %v212_v26 = vld [vmem:[%s387_s2 + $0x10] sm:$0xff] }
  0x25   :  { %208 = vadd.xlane.f32.xlu2 %v207_v18  ;;  %v171_v31 = vadd.f32 %v170_v25, %v129_v14  ;;  %v196_v20 = vsel %vm165_vm0, %v150_v16, 0.0  ;;  %v132_v32 = vmul.f32 %v304_v34, %v66_v17 }
  0x26   :  { %v194_v19 = vadd.f32 %v193_v21, %v148_v7  ;;  %v134_v35 = vmul.f32 %v299_v27, %v68_v28  ;;  %v133_v37 = vmul.f32 %v307_v39, %v67_v29  ;;  %v210_v27 = vld [vmem:[%s387_s2] sm:$0xff] }
  0x27   :  { %v172_v33 = vadd.f32 %v171_v31, %v130_v22 }
  0x28   :  { %v195_v23 = vadd.f32 %v194_v19, %v149_v15  ;;  %v176_v40 = vsel %vm165_vm0, %v134_v35, 0.0 }
  0x29   :  { %v173_v24 = vadd.f32 %v172_v33, %v131_v30 }
  0x2a   :  { %v197_v36 = vadd.f32 %v196_v20, %v195_v23 }
  0x2b   :  { %v174_v38 = vadd.f32 %v173_v24, %v132_v32 }
  0x2c   :  { %198 = vadd.xlane.f32.xlu1 %v197_v36 }
  0x2d   :  { %v175_v41 = vadd.f32 %v174_v38, %v133_v37 }
  0x2f   :  { %v177_v42 = vadd.f32 %v176_v40, %v175_v41 }
  0x31   :  { %178 = vadd.xlane.f32.xlu0 %v177_v42 }
  0x8f   :  { %v189_v34 = vpop.xlane.xlu1 %188 }
  0x90   :  { %v217_v43 = vadd.f32 %v212_v26, %v189_v34 }
  0x92   :  { %223 = vst.msk [vmem:[%s388_s3 + $0x10] sm:$0xff] %vm220_vm1, %v217_v43  ;;  %v169_v39 = vpop.xlane.xlu0 %168 }
  0x93   :  { %v215_v44 = vadd.f32 %v210_v27, %v169_v39 }
  0x95   :  { %221 = vst.msk [vmem:[%s388_s3] sm:$0xff] %vm220_vm1, %v215_v44 }
  0x98   :  { %v209_v46 = vpop.xlane.xlu2 %208 }
  0x99   :  { %v219_v47 = vadd.f32 %v214_v45, %v209_v46 }
  0x9b   :  { %225 = vst.msk [vmem:[%s388_s3 + $0x20] sm:$0xff] %vm220_vm1, %v219_v47 }
  0x9f   :  { %v199_v49 = vpop.xlane.xlu1 %198 }
  0xa0   :  { %v218_v50 = vadd.f32 %v213_v48, %v199_v49 }
  0xa2   :  { %224 = vst.msk [vmem:[%s388_s3 + $0x18] sm:$0xff] %vm220_vm1, %v218_v50 }
  0xa4   :  { %v179_v52 = vpop.xlane.xlu0 %178 }
  0xa5   :  { %v216_v53 = vadd.f32 %v211_v51, %v179_v52 }
  0xa7   :  { %222 = vst.msk [vmem:[%s388_s3 + $0x8] sm:$0xff] %vm220_vm1, %v216_v53 }
  0xa8   :  { %230 = vsyncpa [#allocation3], 1 }

</bundles_post_ra>
